<compile_context>
chip_gen: v7x
topology: tpu7x:2x2x1
jax: 0.10.0
libtpu: 0.0.40
codegen_flags: <defaults>
</compile_context>

<pallas_src>
import jax
import jax.numpy as jnp
from jax import lax
from jax.experimental import pallas as pl
from jax.experimental.pallas import tpu as pltpu


def _round_up(x, m):
    return (x + m - 1) // m * m


# ---------------------------------------------------------------------------
# Pass A kernels: tiled conv matmul (bf16 operands, f32 MXU accumulation) plus
# per-M-tile channel statistics taken from the f32 accumulator.
#
# Outputs per M tile:
#   conv_ref : (TM, Np)   bf16  conv result (downcast only for HBM storage)
#   s1_ref   : (1, 8, Np) f32   sum_M(conv)   replicated over the 8 sublanes
#   s2_ref   : (1, 8, Np) f32   sum_M(conv^2) replicated over the 8 sublanes
# ---------------------------------------------------------------------------
def _conv_stats_single_k(p_ref, w_ref, conv_ref, s1_ref, s2_ref):
    # Whole K in one tile: store the dot result directly (no zero-init, no
    # accumulator round trip through VMEM).
    acc = jnp.dot(p_ref[...], w_ref[...], preferred_element_type=jnp.float32)
    conv_ref[...] = acc.astype(conv_ref.dtype)
    s1 = jnp.sum(acc, axis=0, keepdims=True)            # stats stay f32
    s2 = jnp.sum(acc * acc, axis=0, keepdims=True)
    s1_ref[...] = jnp.broadcast_to(s1, s1_ref.shape)
    s2_ref[...] = jnp.broadcast_to(s2, s2_ref.shape)


def _conv_stats_multi_k(p_ref, w_ref, conv_ref, s1_ref, s2_ref, acc_ref):
    k = pl.program_id(1)
    part = jnp.dot(p_ref[...], w_ref[...], preferred_element_type=jnp.float32)

    @pl.when(k == 0)
    def _():
        acc_ref[...] = part            # first K step assigns: no zero-fill

    @pl.when(k != 0)
    def _():
        acc_ref[...] += part

    @pl.when(k == pl.num_programs(1) - 1)
    def _():
        acc = acc_ref[...]
        conv_ref[...] = acc.astype(conv_ref.dtype)       # bf16 only for HBM
        s1 = jnp.sum(acc, axis=0, keepdims=True)         # stats from f32 acc
        s2 = jnp.sum(acc * acc, axis=0, keepdims=True)
        s1_ref[...] = jnp.broadcast_to(s1, s1_ref.shape)
        s2_ref[...] = jnp.broadcast_to(s2, s2_ref.shape)


def basic_conv2d(x_nchw, params, *, stride=1, padding=0, blck_out=False,
                 eps=1e-5, max_tk=None):
    """Forward pass of BasicConv2d (groups=1). x_nchw: (N, Cin, H, W) f32.

    max_tk: optional cap on the K tile (testing / VMEM tuning).
    """
    w = params["weight"]                         # (Cout, Cin, KH, KW) torch
    gamma = params["gamma"].astype(jnp.float32)
    beta = params["beta"].astype(jnp.float32)

    Cout, Cin, KH, KW = w.shape
    N, C, H, W = x_nchw.shape
    assert C == Cin, "groups != 1 is not supported"

    OH = (H + 2 * padding - KH) // stride + 1
    OW = (W + 2 * padding - KW) // stride + 1
    M = N * OH * OW
    K = KH * KW * Cin

    # ---- im2col in plain JAX; cast to bf16 *before* slicing so the KH*KW-
    # duplicated patch tensor only moves bf16 bytes through HBM. ----
    # TODO(synk): replace the HBM im2col with an in-kernel (kh, kw) tap loop
    # over shifted NHWC row windows (manual DMA) to remove the duplication.
    xb = jnp.transpose(x_nchw, (0, 2, 3, 1)).astype(jnp.bfloat16)   # NHWC bf16
    if padding:
        xb = jnp.pad(xb, ((0, 0), (padding, padding),
                          (padding, padding), (0, 0)))
    patches = []
    for i in range(KH):
        for j in range(KW):
            patches.append(xb[:, i:i + (OH - 1) * stride + 1:stride,
                                 j:j + (OW - 1) * stride + 1:stride, :])
    p = jnp.concatenate(patches, axis=-1).reshape(M, K)
    wm = jnp.transpose(w, (2, 3, 1, 0)).reshape(K, Cout).astype(jnp.bfloat16)

    # ---- tile sizing against a VMEM working-set budget (v7x: 64 MiB / TC) ----
    Np = _round_up(Cout, 128)               # lane-dense output over Cout

    def _footprint(tm, tk):                 # conservative: includes f32 scratch
        return (2 * tm * tk * 2             # double-buffered patch tile (bf16)
                + 2 * tk * Np * 2           # double-buffered weight tile (bf16)
                + 2 * tm * Np * 2           # double-buffered conv-out tile (bf16)
                + tm * Np * 4               # f32 accumulator scratch (multi-K)
                + 4 * 8 * Np * 4)           # s1 / s2 output tiles

    budget = 24 * 1024 * 1024

    # M tile: as large as the budget allows while keeping >= 2 tiles so the
    # "parallel" M axis can shard across v7x's two TensorCores.
    if M > 1024:
        TM = 1024
    elif M > 512:
        TM = 512
    elif M > 256:
        TM = 256
    elif M > 128:
        TM = 128
    else:
        TM = _round_up(max(M, 16), 16)

    # K tile: whole K in one tile (weights DMA'd once, no accumulator RMW)
    # unless it blows the budget or an explicit cap is given.
    TK = _round_up(K, 128)
    if max_tk is not None:
        TK = min(TK, max(128, _round_up(max_tk, 128)))
    while _footprint(TM, TK) > budget and TK > 512:
        TK = max(512, _round_up(TK // 2, 128))
    while _footprint(TM, TK) > budget and TM > 256:
        TM //= 2

    Mp = _round_up(M, TM)
    Kp = _round_up(K, TK)
    num_m = Mp // TM
    num_k = Kp // TK

    # Zero padding keeps the statistics exact: padded rows are all-zero conv
    # rows, so dividing s1/s2 by the true M is correct.
    p_pad = jnp.pad(p, ((0, Mp - M), (0, Kp - K)))
    w_pad = jnp.pad(wm, ((0, Kp - K), (0, Np - Cout)))

    vmem_limit = int(min(64 * 1024 * 1024,
                         max(_footprint(TM, TK) + 4 * 1024 * 1024,
                             16 * 1024 * 1024)))

    flops = 2 * int(Mp) * int(Kp) * int(Np)
    bytes_accessed = (int(Mp) * int(Kp) * 2 + int(Kp) * int(Np) * 2 * num_m
                      + int(Mp) * int(Np) * 2 + 2 * num_m * 8 * int(Np) * 4)

    if num_k == 1:
        kernel = _conv_stats_single_k
        scratch_shapes = []
    else:
        kernel = _conv_stats_multi_k
        scratch_shapes = [pltpu.VMEM((TM, Np), jnp.float32)]

    conv_bf16, s1_t, s2_t = pl.pallas_call(
        kernel,
        out_shape=(
            jax.ShapeDtypeStruct((Mp, Np), jnp.bfloat16),
            jax.ShapeDtypeStruct((num_m, 8, Np), jnp.float32),
            jax.ShapeDtypeStruct((num_m, 8, Np), jnp.float32),
        ),
        grid_spec=pltpu.PrefetchScalarGridSpec(
            num_scalar_prefetch=0,
            grid=(num_m, num_k),
            in_specs=[
                pl.BlockSpec((TM, TK), lambda m, k: (m, k)),
                pl.BlockSpec((TK, Np), lambda m, k: (k, 0)),
            ],
            out_specs=(
                pl.BlockSpec((TM, Np), lambda m, k: (m, 0)),
                pl.BlockSpec((1, 8, Np), lambda m, k: (m, 0, 0)),
                pl.BlockSpec((1, 8, Np), lambda m, k: (m, 0, 0)),
            ),
            scratch_shapes=scratch_shapes),
        compiler_params=pltpu.CompilerParams(
            dimension_semantics=("parallel", "arbitrary"),
            vmem_limit_bytes=vmem_limit),
        cost_estimate=pl.CostEstimate(flops=flops, transcendentals=0,
                                      bytes_accessed=bytes_accessed),
    )(p_pad, w_pad)

    # ---- tiny global stat reduction + BN fold + fused epilogue (plain JAX) ----
    # Train-mode BN => batch statistics; the conv bias cancels exactly under
    # the mean subtraction so it never enters the math.
    s1 = jnp.sum(s1_t[:, 0, :Cout], axis=0)
    s2 = jnp.sum(s2_t[:, 0, :Cout], axis=0)
    mean = s1 / M
    var = jnp.maximum(s2 / M - mean * mean, 0.0)     # biased var (torch BN)
    inv_std = lax.rsqrt(var + eps)
    scale = gamma * inv_std
    shift = beta - mean * scale

    # Single fused XLA pass: read the bf16 conv once, FMA (+ ReLU), reshape
    # and transpose back to NCHW.
    y = conv_bf16[:M, :Cout].astype(jnp.float32) * scale + shift
    if not blck_out:
        y = jnp.maximum(y, 0.0)
    y = y.reshape(N, OH, OW, Cout)
    return jnp.transpose(y, (0, 3, 1, 2))


def _reference(x_nchw, params, *, stride=1, padding=0, blck_out=False,
               eps=1e-5):
    """Pure-JAX reference (lax.conv + batch-stat BN + ReLU).

    Operands are rounded to bf16 to mirror the kernel's bf16-operand / f32-
    accumulation matmul; the conv, the statistics and the epilogue stay f32,
    so the comparison tolerance only needs to absorb the kernel's bf16
    storage of the conv intermediate (<= 1 bf16 ulp of |conv| per element).
    """
    xb = x_nchw.astype(jnp.bfloat16).astype(jnp.float32)
    wb = params["weight"].astype(jnp.bfloat16).astype(jnp.float32)
    conv = lax.conv_general_dilated(
        xb, wb, window_strides=(stride, stride),
        padding=[(padding, padding), (padding, padding)],
        dimension_numbers=("NCHW", "OIHW", "NCHW"),
        preferred_element_type=jnp.float32)
    conv = conv + params["bias"][None, :, None, None]
    mean = jnp.mean(conv, axis=(0, 2, 3), keepdims=True)
    var = jnp.var(conv, axis=(0, 2, 3), keepdims=True)
    y = (conv - mean) * lax.rsqrt(var + eps)
    y = (y * params["gamma"][None, :, None, None]
         + params["beta"][None, :, None, None])
    if not blck_out:
        y = jnp.maximum(y, 0.0)
    return y


if __name__ == "__main__":
    key = jax.random.PRNGKey(0)
    k_x, k_w, k_b, k_g, k_be, k_x2, k_w2 = jax.random.split(key, 7)

    # ---- case 1: nominal small config (single-K-tile fast path) ----
    N, Cin, H, W = 2, 4, 16, 16
    Cout, KH, KW = 8, 3, 3
    x = jax.random.normal(k_x, (N, Cin, H, W), jnp.float32)
    params = {
        "weight": jax.random.normal(k_w, (Cout, Cin, KH, KW), jnp.float32) * 0.1,
        "bias": jax.random.normal(k_b, (Cout,), jnp.float32) * 0.1,
        "gamma": 1.0 + 0.1 * jax.random.normal(k_g, (Cout,), jnp.float32),
        "beta": 0.1 * jax.random.normal(k_be, (Cout,), jnp.float32),
        # running stats exist on the torch module but are unused by the
        # training-mode forward.
        "running_mean": jnp.zeros((Cout,), jnp.float32),
        "running_var": jnp.ones((Cout,), jnp.float32),
    }

    y = jax.block_until_ready(basic_conv2d(x, params))
    assert y.shape == (N, Cout, H - KH + 1, W - KW + 1), y.shape
    y_ref = _reference(x, params)
    assert jnp.allclose(y, y_ref, rtol=1e-2, atol=1e-2), \
        float(jnp.max(jnp.abs(y - y_ref)))

    # blck_out=True (no ReLU) path
    y2 = jax.block_until_ready(basic_conv2d(x, params, blck_out=True))
    y2_ref = _reference(x, params, blck_out=True)
    assert jnp.allclose(y2, y2_ref, rtol=1e-2, atol=1e-2), \
        float(jnp.max(jnp.abs(y2 - y2_ref)))

    # ---- case 2: padding + forced K split to exercise the multi-K path ----
    N2, Cin2, H2, W2, Cout2 = 2, 32, 8, 8, 16
    x2 = jax.random.normal(k_x2, (N2, Cin2, H2, W2), jnp.float32)
    params2 = {
        "weight": jax.random.normal(k_w2, (Cout2, Cin2, KH, KW),
                                    jnp.float32) * 0.05,
        "bias": jnp.zeros((Cout2,), jnp.float32),
        "gamma": jnp.full((Cout2,), 1.1, jnp.float32),
        "beta": jnp.full((Cout2,), -0.05, jnp.float32),
        "running_mean": jnp.zeros((Cout2,), jnp.float32),
        "running_var": jnp.ones((Cout2,), jnp.float32),
    }
    y3 = jax.block_until_ready(
        basic_conv2d(x2, params2, padding=1, max_tk=128))
    y3_ref = _reference(x2, params2, padding=1)
    assert y3.shape == y3_ref.shape, (y3.shape, y3_ref.shape)
    assert jnp.allclose(y3, y3_ref, rtol=1e-2, atol=1e-2), \
        float(jnp.max(jnp.abs(y3 - y3_ref)))

    print("KERNEL_OK")
</pallas_src>

<mosaic_0001>
module attributes {stable_mosaic.version = 11 : i64} {
  func.func @_conv_stats_single_k(%arg0: i32, %arg1: i32, %arg2: memref<256x128xbf16, #tpu.memory_space<vmem>>, %arg3: memref<128x128xbf16, #tpu.memory_space<vmem>>, %arg4: memref<256x128xbf16, #tpu.memory_space<vmem>>, %arg5: memref<1x8x128xf32, #tpu.memory_space<vmem>>, %arg6: memref<1x8x128xf32, #tpu.memory_space<vmem>>) attributes {dimension_semantics = [#tpu.dimension_semantics<parallel>, #tpu.dimension_semantics<arbitrary>], iteration_bounds = array<i64: 2, 1>, scalar_prefetch = 0 : i64, scratch_operands = 0 : i64, tpu.core_type = #tpu.core_type<tc>, window_params = [{transform_indices = @transform_0, window_bounds = array<i64: 256, 128>}, {transform_indices = @transform_1, window_bounds = array<i64: 128, 128>}, {transform_indices = @transform_2, window_bounds = array<i64: 256, 128>}, {transform_indices = @transform_3, window_bounds = array<i64: 1, 8, 128>}, {transform_indices = @transform_4, window_bounds = array<i64: 1, 8, 128>}]} {
    %c0 = arith.constant 0 : index
    %c0_0 = arith.constant 0 : index
    %0 = vector.load %arg2[%c0, %c0_0] : memref<256x128xbf16, #tpu.memory_space<vmem>>, vector<256x128xbf16>
    %c0_1 = arith.constant 0 : index
    %c0_2 = arith.constant 0 : index
    %1 = vector.load %arg3[%c0_1, %c0_2] : memref<128x128xbf16, #tpu.memory_space<vmem>>, vector<128x128xbf16>
    %cst = arith.constant dense<0.000000e+00> : vector<256x128xf32>
    %2 = tpu.matmul %0, %1, %cst {dimension_numbers = #tpu.dot_dimension_numbers<[1], [0], [0], [1], [0, 0, 1, 1], [], []>} : vector<256x128xbf16>, vector<128x128xbf16>, vector<256x128xf32> -> vector<256x128xf32>
    %3 = arith.truncf %2 : vector<256x128xf32> to vector<256x128xbf16>
    %c0_3 = arith.constant 0 : index
    %c0_4 = arith.constant 0 : index
    %4 = vector.load %arg4[%c0_3, %c0_4] : memref<256x128xbf16, #tpu.memory_space<vmem>>, vector<256x128xbf16>
    tpu.vector_store %arg4[%c0_3, %c0_4], %3 {strides = array<i32>} : memref<256x128xbf16, #tpu.memory_space<vmem>>, vector<256x128xbf16>,
    %cst_5 = arith.constant dense<0.000000e+00> : vector<128xf32>
    %5 = vector.multi_reduction <add>, %2, %cst_5 [0] : vector<256x128xf32> to vector<128xf32>
    %6 = vector.shape_cast %5 : vector<128xf32> to vector<1x128xf32>
    %7 = arith.mulf %2, %2 : vector<256x128xf32>
    %cst_6 = arith.constant dense<0.000000e+00> : vector<128xf32>
    %8 = vector.multi_reduction <add>, %7, %cst_6 [0] : vector<256x128xf32> to vector<128xf32>
    %9 = vector.shape_cast %8 : vector<128xf32> to vector<1x128xf32>
    %10 = vector.shape_cast %6 : vector<1x128xf32> to vector<1x1x128xf32>
    %11 = vector.broadcast %10 : vector<1x1x128xf32> to vector<1x8x128xf32>
    %c0_7 = arith.constant 0 : index
    %c0_8 = arith.constant 0 : index
    %c0_9 = arith.constant 0 : index
    %12 = vector.load %arg5[%c0_7, %c0_8, %c0_9] : memref<1x8x128xf32, #tpu.memory_space<vmem>>, vector<1x8x128xf32>
    tpu.vector_store %arg5[%c0_7, %c0_8, %c0_9], %11 {strides = array<i32>} : memref<1x8x128xf32, #tpu.memory_space<vmem>>, vector<1x8x128xf32>,
    %13 = vector.shape_cast %9 : vector<1x128xf32> to vector<1x1x128xf32>
    %14 = vector.broadcast %13 : vector<1x1x128xf32> to vector<1x8x128xf32>
    %c0_10 = arith.constant 0 : index
    %c0_11 = arith.constant 0 : index
    %c0_12 = arith.constant 0 : index
    %15 = vector.load %arg6[%c0_10, %c0_11, %c0_12] : memref<1x8x128xf32, #tpu.memory_space<vmem>>, vector<1x8x128xf32>
    tpu.vector_store %arg6[%c0_10, %c0_11, %c0_12], %14 {strides = array<i32>} : memref<1x8x128xf32, #tpu.memory_space<vmem>>, vector<1x8x128xf32>,
    return
  }
  func.func @transform_0(%arg0: i32, %arg1: i32) -> (i32, i32) {
    %c0_i32 = arith.constant 0 : i32
    return %arg0, %arg1 : i32, i32
  }
  func.func @transform_1(%arg0: i32, %arg1: i32) -> (i32, i32) {
    %c0_i32 = arith.constant 0 : i32
    %c0_i32_0 = arith.constant 0 : i32
    return %arg1, %c0_i32 : i32, i32
  }
  func.func @transform_2(%arg0: i32, %arg1: i32) -> (i32, i32) {
    %c0_i32 = arith.constant 0 : i32
    %c0_i32_0 = arith.constant 0 : i32
    return %arg0, %c0_i32 : i32, i32
  }
  func.func @transform_3(%arg0: i32, %arg1: i32) -> (i32, i32, i32) {
    %c0_i32 = arith.constant 0 : i32
    %c0_i32_0 = arith.constant 0 : i32
    %c0_i32_1 = arith.constant 0 : i32
    return %arg0, %c0_i32, %c0_i32_0 : i32, i32, i32
  }
  func.func @transform_4(%arg0: i32, %arg1: i32) -> (i32, i32, i32) {
    %c0_i32 = arith.constant 0 : i32
    %c0_i32_0 = arith.constant 0 : i32
    %c0_i32_1 = arith.constant 0 : i32
    return %arg0, %c0_i32, %c0_i32_0 : i32, i32, i32
  }
}

</mosaic_0001>

<bundles_post_ra>
// kernel: tpu_custom_call.1
= control target key start
LH: loop header
LB: loop body
LE: loop exit
PB: predicated region body
PF: predicated region fallthrough
CT: control target
= control target key end

     0   :  { %10 = vsyncpa [#allocation3], 0  ;;  %s2179_s0 = inlined_call_operand.hbm [shape: bf16[512,128], index: 0, kind: input, shape index: {}]   ;;  %s2180_s1 = inlined_call_operand.hbm [shape: bf16[128,128], index: 1, kind: input, shape index: {}]   ;;  %s2181_s2 = inlined_call_operand.hbm [shape: bf16[512,128], index: 2, kind: output, shape index: {0}]   ;;  %s2182_s3 = inlined_call_operand.hbm [shape: f32[2,8,128], index: 3, kind: output, shape index: {1}]   ;;  %s2183_s4 = inlined_call_operand.hbm [shape: f32[2,8,128], index: 4, kind: output, shape index: {2}]  }
   0x1   :  { %12 = vsyncpa [#allocation3 + $0x1], 0 }
   0x2   :  { %13 = vsyncpa [#allocation6], 0 }
   0x3   :  { %14 = vsyncpa [#allocation4], 0 }
   0x4   :  { %16 = vsyncpa [#allocation4 + $0x1], 0 }
   0x5   :  { %17 = vsyncpa [#allocation9], 0 }
   0x6   :  { %19 = vsyncpa [#allocation9 + $0x1], 0  ;;  %s1750_s15 = smov 0   ;;  %s1752_s16 = smov 0  }
   0x7   :  { %s1754_s17 = smov 0   ;;  %s1756_s18 = smov 0  }
   0x8   :  { %s1758_s19 = smov 0   ;;  %s1760_s20 = smov 0  }
   0x9 LB: > { %s1781_s21 = sadd.s32 4294967295, %s1714_s20   ;;  %s2187_s22 = sadd.s32 4294967294, %s1714_s20   ;;  %s1714_s20 = sphi %s1760_s20, %s25_s20   ;;  %s1710_s19 = sphi %s1758_s19, %s2207_s19   ;;  %s1706_s18 = sphi %s1756_s18, %s2206_s18   ;;  %s1702_s17 = sphi %s1754_s17, %s2205_s17   ;;  %s1698_s16 = sphi %s1752_s16, %s2204_s16   ;;  %s1694_s15 = sphi %s1750_s15, %s2203_s15  }
   0xa   : > { %p59_p0 = scmp.ne.s32.totalorder %s1698_s16, %s1694_s15  ;;  %p2184_p1 = scmp.eq.s32.totalorder %s1781_s21, 0 }
   0xb   : > { %p115_p3 = scmp.eq.s32.totalorder %s2187_s22, 1  ;;  %p1105_p5 = scmp.ge.s32.totalorder %s1714_s20, 1 }
   0xc   : > { %p1792_p4 = por %p2184_p1, %p59_p0  ;;  %p174_p7 = scmp.lt.s32.totalorder %s1714_s20, 3 }
   0xd   : > { %p1797_p6 = por %p115_p3, %p59_p0  ;;  %s1716_s26 = smov [#allocation5]  }
   0xe   : > { %s2188_s23 = scalar_select %p1792_p4, 1, 0 }
   0xf   : > { %s2189_s24 = scalar_select %p1797_p6, 1, 0 }
  0x10   : > { %p1802_p8 = pnand %p1105_p5, %p174_p7  ;;  %s189_s27 = sshll.u32 %s1716_s26, 4  ;;  %s190_s27 = int_to_ptr.vmem [resolvable:$true] %s189_s27 }
  0x11   : > { %s37_s29 = sadd.s32 1, %s1710_s19  ;;  %s1510_s6 = scalar_lea.hbm %s2180_s1, 1024 }
  0x12   : > { %s2190_s25 = scalar_select %p1802_p8, 1, 0 }
  0x13   : > { %p1411_p9 = pneg %p1802_p8  ;;  %p1511_p12 = scmp.ne.s32.totalorder %s2180_s1, %s1510_s6 }
  0x14   : > { %p1517_p5 = scmp.lt.u32.totalorder %s1510_s6, %s2180_s1 }
  0x15   : > { %p1811_p11 = pnand %p1411_p9, %p2184_p1 }
  0x17   : > { %p1512_p13 = pneg %p1811_p11 }
  0x19   : > { %p1513_p0 = pnand %p1512_p13, %p1511_p12 }
  0x1b   : > { %p1514_p3 = pneg %p1513_p0 }
  0x1d   : > { %p1519_p7 = pnand %p1517_p5, %p1514_p3 }
  0x1f   : > { %1522 = shalt.err (!%p1519_p7)
}
  0x20   : > { %s1523_s11 = scalar_lea.vmem %s190_s27, 1024  ;;  %p1531_p2 = scmp.lt.s32.totalorder %s190_s27, %s190_s27 }
  0x21   : > { %p1524_p9 = scmp.ne.s32.totalorder %s190_s27, %s1523_s11  ;;  %p1532_p6 = scmp.lt.s32.totalorder %s1523_s11, %s1523_s11 }
  0x23   : > { %p1526_p10 = pnand %p1524_p9, %p1512_p13  ;;  %p1533_p4 = por %p1532_p6, %p1531_p2 }
  0x25   : > { %p1527_p1 = pneg %p1526_p10 }
  0x27   : > { %p1534_p8 = pnand %p1533_p4, %p1527_p1 }
  0x29   : > { %1537 = shalt.err (!%p1534_p8)
}
  0x2a   : > { %s1717_s12 = smov 64   ;;  %s1718_s13 = smov 4  }
  0x2b   : > { %1414 = dma.hbm_to_vmem [thread:$0]  (!%p1811_p11), %s2180_s1, 1024, %s190_s27, [#allocation6], %s1717_s12, %s1717_s12, %s1718_s13  }
  0x2c   : > { %p39_p1 = scmp.ge.s32.totalorder %s37_s29, 2  ;;  %s46_s30 = sadd.s32 1, %s1702_s17 }
  0x2d   : > { %p53_p2 = scmp.ne.s32.totalorder %s1702_s17, %s1698_s16  ;;  %p54_p4 = scmp.eq.s32.totalorder %s1714_s20, 0 }
  0x2e   : > { %s2209_s29 = smov (%p39_p1, %s37_s29), 0  ;;  %p2193_p8 = scmp.eq.s32.totalorder %s1781_s21, 1 }
  0x2f   : > { %p1841_p6 = por %p54_p4, %p53_p2  ;;  %s41_s6 = ssub.s32 %s1710_s19, %s2209_s29 }
  0x30   : > { %p1847_p10 = por %p2193_p8, %p53_p2  ;;  %p1430_p12 = scmp.lt.s32.totalorder %s1714_s20, 2 }
  0x31   : > { %p44_p11 = scmp.eq.s32.totalorder %s41_s6, 0  ;;  %s203_s27 = sand.u32 1, %s1702_s17  }
  0x32   : > { %s1108_s7 = sshll.u32 %s203_s27, 7  ;;  %s1182_s9 = sshll.u32 %s1710_s19, 11 }
  0x33   : > { %s1856_s8 = scalar_select %p44_p11, %s1702_s17, %s46_s30  }
  0x34   : > { %s1862_s14 = scalar_lea.hbm %s2179_s0, %s1182_s9  ;;  %s207_s26 = scalar_lea.vmem [#allocation2], %s1108_s7 }
  0x35   : > { %s215_s22 = sshll.u32 %s207_s26, 4  ;;  %p1868_p13 = pnand %p1430_p12, %p1841_p6  ;;  %s1864_s22 = int_to_ptr.vmem [resolvable:$true] %s215_s22 }
  0x36   : > { %s1872_s30 = scalar_lea.sflag [#allocation3], %s203_s27  ;;  %s1538_s10 = scalar_lea.hbm %s1862_s14, 2048 }
  0x37   : > { %p1539_p0 = scmp.ne.s32.totalorder %s1862_s14, %s1538_s10  ;;  %p1540_p3 = pneg %p1868_p13 }
  0x38   : > { %s1543_s5 = scalar_lea.hbm %s2179_s0, 4096  ;;  %p1544_p9 = scmp.lt.u32.totalorder %s1862_s14, %s2179_s0 }
  0x39   : > { %p1541_p5 = pnand %p1540_p3, %p1539_p0  ;;  %p1545_p1 = scmp.lt.u32.totalorder %s1543_s5, %s1538_s10 }
  0x3a   : > { %p1547_p4 = scmp.lt.u32.totalorder %s1538_s10, %s1862_s14 }
  0x3b   : > { %p1542_p7 = pneg %p1541_p5  ;;  %p1546_p2 = por %p1545_p1, %p1544_p9 }
  0x3d   : > { %p1548_p6 = por %p1547_p4, %p1546_p2 }
  0x3f   : > { %p1549_p8 = pnand %p1548_p6, %p1542_p7 }
  0x41   : > { %1552 = shalt.err (!%p1549_p8)
}
  0x42   : > { %s1553_s27 = scalar_lea.vmem %s1864_s22, 2048  ;;  %s1719_s7 = smov [#allocation2]  }
  0x43   : > { %p1554_p12 = scmp.ne.s32.totalorder %s1864_s22, %s1553_s27  ;;  %s1558_s9 = sshll.u32 %s1719_s7, 4  ;;  %s1559_s9 = int_to_ptr.vmem [resolvable:$false] %s1558_s9 }
  0x44   : > { %s1560_s11 = scalar_lea.vmem %s1559_s9, 4096  ;;  %p1561_p5 = scmp.lt.s32.totalorder %s1864_s22, %s1559_s9 }
  0x45   : > { %p1556_p11 = pnand %p1554_p12, %p1540_p3  ;;  %p1562_p9 = scmp.lt.s32.totalorder %s1560_s11, %s1553_s27 }
  0x47   : > { %p1557_p0 = pneg %p1556_p11  ;;  %p1563_p1 = por %p1562_p9, %p1561_p5 }
  0x49   : > { %p1564_p2 = pnand %p1563_p1, %p1557_p0 }
  0x4b   : > { %1567 = shalt.err (!%p1564_p2)
}
  0x4c   : > { %1418 = dma.hbm_to_vmem [thread:$0]  (!%p1868_p13), %s1862_s14, 2048, %s1864_s22, %s1872_s30, %s1717_s12, %s1717_s12, %s1718_s13  }
  0x4d   : > { %p2196_p3 = scmp.ne.s32.totalorder %s2190_s25, 0 }
  0x4e   : > { %s1906_s10 = sand.u32 (!%p2196_p3), 1, %s1698_s16   ;;  %p2197_p7 = scmp.ne.s32.totalorder (!%p2196_p3), %s2188_s23, 0 }
  0x4f   : > { %227 = sbr.rel (%p2196_p3) target bundleno = 459 (0x1cb), region = 28  ;;  %s1112_s5 = sshll.u32 (!%p2196_p3), %s1906_s10, 7 }
  0x50   : > { %s230_s26 = scalar_lea.sflag (!%p2196_p3), [#allocation3], %s1906_s10  ;;  %s1912_s6 = scalar_lea.vmem (!%p2196_p3), [#allocation2], %s1112_s5 }
  0x56   : > { %1677 = dma.done.wait (%p2197_p7), %s230_s26, 2048  }
  0x57   : > { %1679 = vsyncadd (%p2197_p7), %s230_s26, 4294965248  ;;  %p2198_p13 = scmp.eq.s32.totalorder %s1781_s21, 0 }
  0x59   : > { %1681 = dma.done.wait (%p2198_p13), [#allocation6], 1024   ;;  %p2199_p4 = pmov %p2198_p13 }
  0x5a   : > { %v1486_v0 = vld [vmem:[#allocation5] sm:$0xff]   ;;  %v1487_v1 = vld [vmem:[#allocation5 + $0x8] sm:$0xff]   ;;  %v1488_v2 = vld [vmem:[#allocation5 + $0x10] sm:$0xff]   ;;  %s1952_s22 = scalar_lea.vmem [#allocation7], %s1112_s5  ;;  %s1215_s23 = sshll.u32 %s1706_s18, 11 }
  0x5b   : > { %1683 = vsyncadd (%p2199_p4), [#allocation6], 4294966272  ;;  %1335 = vmatprep.subr.bf16.mxu0 %v1486_v0  ;;  %1383 = vmatprep.subr.bf16.mxu1 %v1486_v0  ;;  %v1489_v3 = vld [vmem:[#allocation5 + $0x18] sm:$0xff]   ;;  %v1494_v4 = vld [vmem:[%s1912_s6] sm:$0xff]   ;;  %s921_s25 = sshll.u32 %s1952_s22, 4  ;;  %s2005_s14 = scalar_lea.hbm %s2181_s2, %s1215_s23  ;;  %s2007_s25 = int_to_ptr.vmem [resolvable:$true] %s921_s25 }
  0x5c   : > { %1336 = vmatpush3.bf16.msra.mxu0 %v1486_v0  ;;  %1391 = vmatpush3.bf16.msra.mxu1 %v1486_v0  ;;  %v1490_v5 = vld [vmem:[#allocation5 + $0x20] sm:$0xff]   ;;  %v1491_v6 = vld [vmem:[#allocation5 + $0x28] sm:$0xff]   ;;  %v1492_v8 = vld [vmem:[#allocation5 + $0x30] sm:$0xff]   ;;  %s898_s30 = scalar_lea.sflag [#allocation4], %s1906_s10  ;;  %s1568_s27 = scalar_lea.vmem %s2007_s25, 2048 }
  0x5d   : > { %1337 = vmatprep.subr.bf16.mxu0 %v1487_v1  ;;  %1384 = vmatprep.subr.bf16.mxu1 %v1487_v1  ;;  %v1502_v7 = vld [vmem:[%s1912_s6 + $0x40] sm:$0xff]   ;;  %v1493_v9 = vld [vmem:[#allocation5 + $0x38] sm:$0xff]   ;;  %v1495_v10 = vld [vmem:[%s1912_s6 + $0x8] sm:$0xff]   ;;  %p1569_p6 = scmp.ne.s32.totalorder %s2007_s25, %s1568_s27  ;;  %s1720_s7 = smov [#allocation7]  }
  0x5e   : > { %1351 = vmatprep.mubr.bf16.mxu0 %v1494_v4  ;;  %1367 = vmatprep.mubr.bf16.mxu1 %v1502_v7  ;;  %v1503_v11 = vld [vmem:[%s1912_s6 + $0x48] sm:$0xff]   ;;  %v1496_v12 = vld [vmem:[%s1912_s6 + $0x10] sm:$0xff]   ;;  %v1497_v14 = vld [vmem:[%s1912_s6 + $0x18] sm:$0xff]   ;;  %s1572_s9 = sshll.u32 %s1720_s7, 4  ;;  %s1573_s9 = int_to_ptr.vmem [resolvable:$false] %s1572_s9 }
  0x5f   : > { %v1504_v13 = vld [vmem:[%s1912_s6 + $0x50] sm:$0xff]   ;;  %v1505_v15 = vld [vmem:[%s1912_s6 + $0x58] sm:$0xff]   ;;  %v1498_v16 = vld [vmem:[%s1912_s6 + $0x20] sm:$0xff]   ;;  %p1570_p8 = pnand %p1569_p6, %p1847_p10  ;;  %s1574_s11 = scalar_lea.vmem %s1573_s9, 4096 }
  0x60   : > { %1338 = vmatpush3.bf16.msra.mxu0 %v1487_v1  ;;  %1392 = vmatpush3.bf16.msra.mxu1 %v1487_v1  ;;  %v1506_v17 = vld [vmem:[%s1912_s6 + $0x60] sm:$0xff]   ;;  %v1499_v18 = vld [vmem:[%s1912_s6 + $0x28] sm:$0xff]   ;;  %v1500_v20 = vld [vmem:[%s1912_s6 + $0x30] sm:$0xff]   ;;  %p1575_p11 = scmp.lt.s32.totalorder %s2007_s25, %s1573_s9  ;;  %p1576_p0 = scmp.lt.s32.totalorder %s1574_s11, %s1568_s27 }
  0x61   : > { %1339 = vmatprep.subr.bf16.mxu0 %v1488_v2  ;;  %1385 = vmatprep.subr.bf16.mxu1 %v1488_v2  ;;  %v1507_v19 = vld [vmem:[%s1912_s6 + $0x68] sm:$0xff]   ;;  %v1508_v21 = vld [vmem:[%s1912_s6 + $0x70] sm:$0xff]   ;;  %v1501_v22 = vld [vmem:[%s1912_s6 + $0x38] sm:$0xff]   ;;  %p1571_p12 = pneg %p1570_p8 }
  0x62   : > { %v1509_v23 = vld [vmem:[%s1912_s6 + $0x78] sm:$0xff]   ;;  %p1577_p5 = por %p1576_p0, %p1575_p11 }
  0x64   : > { %1340 = vmatpush3.bf16.msra.mxu0 %v1488_v2  ;;  %1393 = vmatpush3.bf16.msra.mxu1 %v1488_v2  ;;  %p1578_p9 = pnand %p1577_p5, %p1571_p12 }
  0x65   : > { %1341 = vmatprep.subr.bf16.mxu0 %v1489_v3  ;;  %1386 = vmatprep.subr.bf16.mxu1 %v1489_v3 }
  0x68   : > { %1342 = vmatpush3.bf16.msra.mxu0 %v1489_v3  ;;  %1394 = vmatpush3.bf16.msra.mxu1 %v1489_v3 }
  0x69   : > { %1343 = vmatprep.subr.bf16.mxu0 %v1490_v5  ;;  %1387 = vmatprep.subr.bf16.mxu1 %v1490_v5 }
  0x6c   : > { %1344 = vmatpush3.bf16.msra.mxu0 %v1490_v5  ;;  %1395 = vmatpush3.bf16.msra.mxu1 %v1490_v5 }
  0x6d   : > { %1345 = vmatprep.subr.bf16.mxu0 %v1491_v6  ;;  %1388 = vmatprep.subr.bf16.mxu1 %v1491_v6 }
  0x70   : > { %1346 = vmatpush3.bf16.msra.mxu0 %v1491_v6  ;;  %1396 = vmatpush3.bf16.msra.mxu1 %v1491_v6 }
  0x71   : > { %1347 = vmatprep.subr.bf16.mxu0 %v1492_v8  ;;  %1389 = vmatprep.subr.bf16.mxu1 %v1492_v8 }
  0x74   : > { %1348 = vmatpush3.bf16.msra.mxu0 %v1492_v8  ;;  %1397 = vmatpush3.bf16.msra.mxu1 %v1492_v8 }
  0x75   : > { %1349 = vmatprep.subr.bf16.mxu0 %v1493_v9  ;;  %1390 = vmatprep.subr.bf16.mxu1 %v1493_v9 }
  0x78   : > { %1350 = vmatpush3.bf16.msra.mxu0 %v1493_v9  ;;  %1398 = vmatpush3.bf16.msra.mxu1 %v1493_v9 }
  0x7b   : > { %1352 = vmatmul.mubr.bf16.vlgmr.msra.gmra.mrb[0].mxu0 %v1495_v10  ;;  %1368 = vmatmul.mubr.bf16.vlgmr.msra.gmra.mrb[0].mxu1 %v1503_v11 }
  0x7c   : > { %1355 = vmatprep.mubr.bf16.mxu0 %v1496_v12  ;;  %1371 = vmatprep.mubr.bf16.mxu1 %v1504_v13 }
  0x83   : > { %1356 = vmatmul.mubr.bf16.gmra.mrb[4].mxu0 %v1497_v14  ;;  %1372 = vmatmul.mubr.bf16.gmra.mrb[4].mxu1 %v1505_v15 }
  0x84   : > { %1359 = vmatprep.mubr.bf16.mxu0 %v1498_v16  ;;  %1375 = vmatprep.mubr.bf16.mxu1 %v1506_v17 }
  0x8b   : > { %1360 = vmatmul.mubr.bf16.gmra.mrb[8].mxu0 %v1499_v18  ;;  %1376 = vmatmul.mubr.bf16.gmra.mrb[8].mxu1 %v1507_v19 }
  0x8c   : > { %1363 = vmatprep.mubr.bf16.mxu0 %v1500_v20  ;;  %1379 = vmatprep.mubr.bf16.mxu1 %v1508_v21 }
  0x93   : > { %1364 = vmatmul.mubr.bf16.gmra.mrb[12].mxu0 %v1501_v22  ;;  %1380 = vmatmul.mubr.bf16.gmra.mrb[12].mxu1 %v1509_v23 }
 0x14e   : > { %v1353_v24 = vpop.f32.mrb[0].mxu0  ;;  %v1938_v25 = vpop.f32.mrb[0].mxu1 }
 0x14f   : > { %v502_v26 = vpop.f32.mrb[1].mxu0  ;;  %v1940_v27 = vpop.f32.mrb[1].mxu1  ;;  %v828_v39 = vmul.f32 %v1353_v24, %v1353_v24 }
 0x150   : > { %v1354_v28 = vpop.f32.mrb[2].mxu0  ;;  %v1942_v29 = vpop.f32.mrb[2].mxu1  ;;  %v826_v30 = vmul.f32 %v502_v26, %v502_v26 }
 0x151   : > { %v1224_v31 = vpack.c.bf16 %v1354_v28, %v1353_v24  ;;  %v505_v32 = vpop.f32.mrb[3].mxu0  ;;  %v1264_v33 = vpack.c.bf16 %v1942_v29, %v1938_v25  ;;  %v1946_v34 = vpop.f32.mrb[3].mxu1  ;;  %v829_v42 = vmul.f32 %v1354_v28, %v1354_v28 }
 0x152   : > { %v1219_v35 = vpack.c.bf16 %v505_v32, %v502_v26  ;;  %v789_v36 = vadd.f32 %v505_v32, %v502_v26  ;;  %v827_v37 = vmul.f32 %v505_v32, %v505_v32  ;;  %v1259_v38 = vpack.c.bf16 %v1946_v34, %v1940_v27 }
 0x153   : > { %1296 = vst [vmem:[%s1952_s22 + $0x8] sm:$0xff] %v1224_v31   ;;  %1304 = vst [vmem:[%s1952_s22 + $0x48] sm:$0xff] %v1264_v33  }
 0x154   : > { %1220 = vst [vmem:[%s1952_s22] sm:$0xff] %v1219_v35   ;;  %v790_v40 = vadd.f32 %v1353_v24, %v789_v36  ;;  %v858_v41 = vadd.f32 %v827_v37, %v826_v30  ;;  %1303 = vst [vmem:[%s1952_s22 + $0x40] sm:$0xff] %v1259_v38  }
 0x156   : > { %v859_v43 = vadd.f32 %v858_v41, %v828_v39  ;;  %v1357_v44 = vpop.f32.mrb[4].mxu0  ;;  %v791_v45 = vadd.f32 %v1354_v28, %v790_v40  ;;  %v1958_v46 = vpop.f32.mrb[4].mxu1 }
 0x157   : > { %v518_v47 = vpop.f32.mrb[5].mxu0  ;;  %v1960_v48 = vpop.f32.mrb[5].mxu1  ;;  %v832_v63 = vmul.f32 %v1357_v44, %v1357_v44 }
 0x158   : > { %v792_v49 = vadd.f32 %v791_v45, %v518_v47  ;;  %v830_v50 = vmul.f32 %v518_v47, %v518_v47  ;;  %v860_v51 = vadd.f32 %v859_v43, %v829_v42  ;;  %v1358_v52 = vpop.f32.mrb[6].mxu0  ;;  %v1962_v53 = vpop.f32.mrb[6].mxu1 }
 0x159   : > { %v1234_v54 = vpack.c.bf16 %v1358_v52, %v1357_v44  ;;  %v521_v55 = vpop.f32.mrb[7].mxu0  ;;  %v1274_v56 = vpack.c.bf16 %v1962_v53, %v1958_v46  ;;  %v1966_v57 = vpop.f32.mrb[7].mxu1  ;;  %v833_v2 = vmul.f32 %v1358_v52, %v1358_v52 }
 0x15a   : > { %v861_v58 = vadd.f32 %v860_v51, %v830_v50  ;;  %v1229_v59 = vpack.c.bf16 %v521_v55, %v518_v47  ;;  %v793_v60 = vadd.f32 %v792_v49, %v521_v55  ;;  %v831_v61 = vmul.f32 %v521_v55, %v521_v55 }
 0x15b   : > { %1298 = vst [vmem:[%s1952_s22 + $0x18] sm:$0xff] %v1234_v54   ;;  %1306 = vst [vmem:[%s1952_s22 + $0x58] sm:$0xff] %v1274_v56   ;;  %v1269_v62 = vpack.c.bf16 %v1966_v57, %v1960_v48 }
 0x15c   : > { %1297 = vst [vmem:[%s1952_s22 + $0x10] sm:$0xff] %v1229_v59   ;;  %v794_v0 = vadd.f32 %v1357_v44, %v793_v60  ;;  %v862_v1 = vadd.f32 %v861_v58, %v831_v61  ;;  %v842_v61 = vmul.f32 %v1940_v27, %v1940_v27 }
 0x15d   : > { %1305 = vst [vmem:[%s1952_s22 + $0x50] sm:$0xff] %v1269_v62  }
 0x15e   : > { %v863_v3 = vadd.f32 %v862_v1, %v832_v63  ;;  %v1361_v4 = vpop.f32.mrb[8].mxu0  ;;  %v795_v5 = vadd.f32 %v1358_v52, %v794_v0  ;;  %v1974_v6 = vpop.f32.mrb[8].mxu1 }
 0x15f   : > { %v534_v7 = vpop.f32.mrb[9].mxu0  ;;  %v1976_v8 = vpop.f32.mrb[9].mxu1  ;;  %v836_v23 = vmul.f32 %v1361_v4, %v1361_v4 }
 0x160   : > { %v796_v9 = vadd.f32 %v795_v5, %v534_v7  ;;  %v834_v10 = vmul.f32 %v534_v7, %v534_v7  ;;  %v864_v11 = vadd.f32 %v863_v3, %v833_v2  ;;  %v1362_v12 = vpop.f32.mrb[10].mxu0  ;;  %v1978_v13 = vpop.f32.mrb[10].mxu1 }
 0x161   : > { %v1244_v14 = vpack.c.bf16 %v1362_v12, %v1361_v4  ;;  %v537_v15 = vpop.f32.mrb[11].mxu0  ;;  %v1284_v16 = vpack.c.bf16 %v1978_v13, %v1974_v6  ;;  %v1982_v17 = vpop.f32.mrb[11].mxu1  ;;  %v837_v28 = vmul.f32 %v1362_v12, %v1362_v12 }
 0x162   : > { %v865_v18 = vadd.f32 %v864_v11, %v834_v10  ;;  %v1239_v19 = vpack.c.bf16 %v537_v15, %v534_v7  ;;  %v797_v20 = vadd.f32 %v796_v9, %v537_v15  ;;  %v835_v21 = vmul.f32 %v537_v15, %v537_v15 }
 0x163   : > { %1300 = vst [vmem:[%s1952_s22 + $0x28] sm:$0xff] %v1244_v14   ;;  %1308 = vst [vmem:[%s1952_s22 + $0x68] sm:$0xff] %v1284_v16   ;;  %v1279_v22 = vpack.c.bf16 %v1982_v17, %v1976_v8 }
 0x164   : > { %1299 = vst [vmem:[%s1952_s22 + $0x20] sm:$0xff] %v1239_v19   ;;  %v798_v24 = vadd.f32 %v1361_v4, %v797_v20  ;;  %v866_v26 = vadd.f32 %v865_v18, %v835_v21 }
 0x165   : > { %1307 = vst [vmem:[%s1952_s22 + $0x60] sm:$0xff] %v1279_v22  }
 0x166   : > { %v867_v30 = vadd.f32 %v866_v26, %v836_v23  ;;  %v1365_v31 = vpop.f32.mrb[12].mxu0  ;;  %v799_v32 = vadd.f32 %v1362_v12, %v798_v24  ;;  %v1990_v33 = vpop.f32.mrb[12].mxu1 }
 0x167   : > { %v550_v35 = vpop.f32.mrb[13].mxu0  ;;  %v1992_v36 = vpop.f32.mrb[13].mxu1  ;;  %v840_v54 = vmul.f32 %v1365_v31, %v1365_v31 }
 0x168   : > { %v800_v37 = vadd.f32 %v799_v32, %v550_v35  ;;  %v838_v38 = vmul.f32 %v550_v35, %v550_v35  ;;  %v868_v39 = vadd.f32 %v867_v30, %v837_v28  ;;  %v1366_v40 = vpop.f32.mrb[14].mxu0  ;;  %v1996_v41 = vpop.f32.mrb[14].mxu1 }
 0x169   : > { %v1254_v42 = vpack.c.bf16 %v1366_v40, %v1365_v31  ;;  %v553_v43 = vpop.f32.mrb[15].mxu0  ;;  %v1294_v44 = vpack.c.bf16 %v1996_v41, %v1990_v33  ;;  %v2000_v45 = vpop.f32.mrb[15].mxu1  ;;  %v841_v58 = vmul.f32 %v1366_v40, %v1366_v40 }
 0x16a   : > { %v869_v47 = vadd.f32 %v868_v39, %v838_v38  ;;  %v1249_v49 = vpack.c.bf16 %v553_v43, %v550_v35  ;;  %v801_v50 = vadd.f32 %v800_v37, %v553_v43  ;;  %v839_v51 = vmul.f32 %v553_v43, %v553_v43 }
 0x16b   : > { %1302 = vst [vmem:[%s1952_s22 + $0x38] sm:$0xff] %v1254_v42   ;;  %1310 = vst [vmem:[%s1952_s22 + $0x78] sm:$0xff] %v1294_v44   ;;  %v1289_v52 = vpack.c.bf16 %v2000_v45, %v1992_v36 }
 0x16c   : > { %1301 = vst [vmem:[%s1952_s22 + $0x30] sm:$0xff] %v1249_v49   ;;  %v802_v55 = vadd.f32 %v1365_v31, %v801_v50  ;;  %v870_v56 = vadd.f32 %v869_v47, %v839_v51 }
 0x16d   : > { %1309 = vst [vmem:[%s1952_s22 + $0x70] sm:$0xff] %v1289_v52  }
 0x16e   : > { %v871_v59 = vadd.f32 %v870_v56, %v840_v54  ;;  %v803_v60 = vadd.f32 %v1366_v40, %v802_v55 }
 0x16f   : > { %1581 = shalt.err (!%p1578_p9)
}
 0x170   : > { %s1582_s5 = scalar_lea.hbm %s2005_s14, 2048  ;;  %s1586_s22 = scalar_lea.hbm %s2181_s2, 4096 }
 0x171   : > { %p1583_p1 = scmp.ne.s32.totalorder %s2005_s14, %s1582_s5  ;;  %p1587_p7 = scmp.lt.u32.totalorder %s2005_s14, %s2181_s2 }
 0x172   : > { %p1588_p13 = scmp.lt.u32.totalorder %s1586_s22, %s1582_s5  ;;  %p1590_p6 = scmp.lt.u32.totalorder %s1582_s5, %s2005_s14 }
 0x173   : > { %p1584_p2 = pnand %p1583_p1, %p1847_p10 }
 0x174   : > { %p1589_p4 = por %p1588_p13, %p1587_p7 }
 0x175   : > { %p1585_p3 = pneg %p1584_p2 }
 0x176   : > { %p1591_p8 = por %p1590_p6, %p1589_p4 }
 0x178   : > { %p1592_p12 = pnand %p1591_p8, %p1585_p3 }
 0x17a   : > { %1595 = shalt.err (!%p1592_p12)
}
 0x17b   : > { %s1721_s13 = smov 64   ;;  %s1722_s27 = smov 4   ;;  %v804_v62 = vadd.f32 %v803_v60, %v1940_v27  ;;  %v872_v63 = vadd.f32 %v871_v59, %v841_v58  ;;  %v843_v2 = vmul.f32 %v1946_v34, %v1946_v34  ;;  %v844_v3 = vmul.f32 %v1938_v25, %v1938_v25 }
 0x17c   : > { %1405 = dma.vmem_to_hbm [thread:$0]  (%p1847_p10), %s2007_s25, 2048, %s2005_s14, %s898_s30, %s1721_s13, %s1721_s13, %s1722_s27   ;;  %v845_v7 = vmul.f32 %v1942_v29, %v1942_v29  ;;  %v846_v27 = vmul.f32 %v1960_v48, %v1960_v48  ;;  %v847_v15 = vmul.f32 %v1966_v57, %v1966_v57  ;;  %v851_v24 = vmul.f32 %v1982_v17, %v1982_v17 }
 0x17d   : > { %v873_v0 = vadd.f32 %v872_v63, %v842_v61  ;;  %v805_v1 = vadd.f32 %v804_v62, %v1946_v34  ;;  %v854_v31 = vmul.f32 %v1992_v36, %v1992_v36  ;;  %v856_v38 = vmul.f32 %v1990_v33, %v1990_v33  ;;  %s1115_s25 = sshll.u32 %s1906_s10, 3  ;;  %s902_s14 = sand.u32 1, %s1781_s21  }
 0x17e   : > { %v857_v40 = vmul.f32 %v1996_v41, %v1996_v41  ;;  %s1178_s30 = sshll.u32 %s1706_s18, 7  ;;  %s264_s7 = scalar_lea.vmem [#allocation8], %s1115_s25 }
 0x17f   : > { %v806_v4 = vadd.f32 %v1938_v25, %v805_v1  ;;  %v874_v5 = vadd.f32 %v873_v0, %v843_v2  ;;  %v848_v25 = vmul.f32 %v1958_v46, %v1958_v46  ;;  %s937_s9 = sshll.u32 %s264_s7, 4  ;;  %s2090_s11 = scalar_lea.vmem [#allocation10], %s1115_s25  ;;  %s2098_s9 = int_to_ptr.vmem [resolvable:$true] %s937_s9 }
 0x180   : > { %s950_s5 = sshll.u32 %s2090_s11, 4  ;;  %s2096_s6 = scalar_lea.hbm %s2182_s3, %s1178_s30  ;;  %s2105_s5 = int_to_ptr.vmem [resolvable:$true] %s950_s5 }
 0x181   : > { %v875_v9 = vadd.f32 %v874_v5, %v844_v3  ;;  %v807_v10 = vadd.f32 %v1942_v29, %v806_v4  ;;  %v849_v29 = vmul.f32 %v1962_v53, %v1962_v53  ;;  %s2103_s22 = scalar_lea.hbm %s2183_s4, %s1178_s30  ;;  %s2107_s23 = scalar_lea.sflag [#allocation9], %s902_s14 }
 0x182   : > { %s1596_s12 = scalar_lea.vmem %s2098_s9, 128  ;;  %s1723_s13 = smov [#allocation8]  }
 0x183   : > { %v808_v11 = vadd.f32 %v807_v10, %v1960_v48  ;;  %v876_v12 = vadd.f32 %v875_v9, %v845_v7  ;;  %v850_v48 = vmul.f32 %v1976_v8, %v1976_v8  ;;  %p1597_p11 = scmp.ne.s32.totalorder %s2098_s9, %s1596_s12  ;;  %s1600_s27 = sshll.u32 %s1723_s13, 4  ;;  %s1601_s27 = int_to_ptr.vmem [resolvable:$false] %s1600_s27 }
 0x184   : > { %s1602_s25 = scalar_lea.vmem %s1601_s27, 256  ;;  %p1603_p9 = scmp.lt.s32.totalorder %s2098_s9, %s1601_s27 }
 0x185   : > { %v877_v14 = vadd.f32 %v876_v12, %v846_v27  ;;  %v809_v34 = vadd.f32 %v808_v11, %v1966_v57  ;;  %p1598_p0 = pnand %p1597_p11, %p1847_p10  ;;  %p1604_p1 = scmp.lt.s32.totalorder %s1602_s25, %s1596_s12 }
 0x187   : > { %v810_v16 = vadd.f32 %v1958_v46, %v809_v34  ;;  %v878_v18 = vadd.f32 %v877_v14, %v847_v15  ;;  %v852_v46 = vmul.f32 %v1974_v6, %v1974_v6  ;;  %p1599_p5 = pneg %p1598_p0  ;;  %p1605_p2 = por %p1604_p1, %p1603_p9 }
 0x189   : > { %v879_v19 = vadd.f32 %v878_v18, %v848_v25  ;;  %v811_v20 = vadd.f32 %v1962_v53, %v810_v16  ;;  %v853_v53 = vmul.f32 %v1978_v13, %v1978_v13  ;;  %p1606_p3 = pnand %p1605_p2, %p1599_p5 }
 0x18b   : > { %v812_v21 = vadd.f32 %v811_v20, %v1976_v8  ;;  %v880_v22 = vadd.f32 %v879_v19, %v849_v29 }
 0x18d   : > { %v881_v23 = vadd.f32 %v880_v22, %v850_v48  ;;  %v813_v57 = vadd.f32 %v812_v21, %v1982_v17 }
 0x18f   : > { %v814_v26 = vadd.f32 %v1974_v6, %v813_v57  ;;  %v882_v28 = vadd.f32 %v881_v23, %v851_v24  ;;  %v855_v6 = vmul.f32 %v2000_v45, %v2000_v45 }
 0x191   : > { %v883_v30 = vadd.f32 %v882_v28, %v852_v46  ;;  %v815_v8 = vadd.f32 %v1978_v13, %v814_v26 }
 0x193   : > { %v816_v32 = vadd.f32 %v815_v8, %v1992_v36  ;;  %v884_v35 = vadd.f32 %v883_v30, %v853_v53 }
 0x195   : > { %v885_v17 = vadd.f32 %v884_v35, %v854_v31  ;;  %v817_v37 = vadd.f32 %v816_v32, %v2000_v45 }
 0x197   : > { %v818_v39 = vadd.f32 %v1990_v33, %v817_v37  ;;  %v886_v13 = vadd.f32 %v885_v17, %v855_v6 }
 0x199   : > { %v819_v36 = vadd.f32 %v1996_v41, %v818_v39  ;;  %v887_v42 = vadd.f32 %v886_v13, %v856_v38 }
 0x19b   : > { %v820_v43 = vrot.slane %v819_v36, 4  ;;  %v888_v44 = vadd.f32 %v887_v42, %v857_v40 }
 0x19d   : > { %v821_v47 = vadd.f32 %v820_v43, %v819_v36  ;;  %v889_v49 = vrot.slane %v888_v44, 4 }
 0x19f   : > { %v822_v45 = vrot.slane %v821_v47, 2  ;;  %v890_v50 = vadd.f32 %v889_v49, %v888_v44 }
 0x1a1   : > { %v823_v51 = vadd.f32 %v822_v45, %v821_v47  ;;  %v891_v52 = vrot.slane %v890_v50, 2 }
 0x1a3   : > { %v824_v33 = vrot.slane %v823_v51, 1  ;;  %v892_v54 = vadd.f32 %v891_v52, %v890_v50 }
 0x1a5   : > { %v893_v41 = vrot.slane %v892_v54, 1  ;;  %v825_v55 = vadd.f32 %v824_v33, %v823_v51 }
 0x1a7   : > { %895 = vst [vmem:[%s264_s7] sm:$0xff] %v825_v55  ;;  %v894_v56 = vadd.f32 %v893_v41, %v892_v54 }
 0x1a8   : > { %1609 = shalt.err (!%p1606_p3)
}
 0x1a9   : > { %s1610_s14 = scalar_lea.hbm %s2096_s6, 128  ;;  %s1614_s10 = scalar_lea.hbm %s2182_s3, 256 }
 0x1aa   : > { %p1611_p7 = scmp.ne.s32.totalorder %s2096_s6, %s1610_s14  ;;  %p1615_p6 = scmp.lt.u32.totalorder %s2096_s6, %s2182_s3 }
 0x1ab   : > { %p1616_p8 = scmp.lt.u32.totalorder %s1614_s10, %s1610_s14  ;;  %p1618_p11 = scmp.lt.u32.totalorder %s1610_s14, %s2096_s6 }
 0x1ac   : > { %p1612_p13 = pnand %p1611_p7, %p1847_p10 }
 0x1ad   : > { %p1617_p12 = por %p1616_p8, %p1615_p6 }
 0x1ae   : > { %p1613_p4 = pneg %p1612_p13 }
 0x1af   : > { %p1619_p0 = por %p1618_p11, %p1617_p12 }
 0x1b1   : > { %p1620_p5 = pnand %p1619_p0, %p1613_p4 }
 0x1b3   : > { %1623 = shalt.err (!%p1620_p5)
}
 0x1b4   : > { %1406 = dma.vmem_to_hbm [thread:$0]  (%p1847_p10), %s2098_s9, 128, %s2096_s6, %s2107_s23   ;;  %896 = vst [vmem:[%s2090_s11] sm:$0xff] %v894_v56 }
 0x1b5   : > { %s1624_s21 = scalar_lea.vmem %s2105_s5, 128  ;;  %s1724_s12 = smov [#allocation10]  }
 0x1b6   : > { %p1625_p9 = scmp.ne.s32.totalorder %s2105_s5, %s1624_s21  ;;  %s1628_s13 = sshll.u32 %s1724_s12, 4  ;;  %s1629_s13 = int_to_ptr.vmem [resolvable:$false] %s1628_s13 }
 0x1b7   : > { %s1630_s27 = scalar_lea.vmem %s1629_s13, 256  ;;  %p1631_p3 = scmp.lt.s32.totalorder %s2105_s5, %s1629_s13 }
 0x1b8   : > { %p1626_p1 = pnand %p1625_p9, %p1847_p10  ;;  %p1632_p7 = scmp.lt.s32.totalorder %s1630_s27, %s1624_s21 }
 0x1ba   : > { %p1627_p2 = pneg %p1626_p1  ;;  %p1633_p13 = por %p1632_p7, %p1631_p3 }
 0x1bc   : > { %p1634_p4 = pnand %p1633_p13, %p1627_p2 }
 0x1be   : > { %1637 = shalt.err (!%p1634_p4)
}
 0x1bf   : > { %s1638_s9 = scalar_lea.hbm %s2103_s22, 128  ;;  %s1642_s25 = scalar_lea.hbm %s2183_s4, 256 }
 0x1c0   : > { %p1639_p6 = scmp.ne.s32.totalorder %s2103_s22, %s1638_s9  ;;  %p1643_p11 = scmp.lt.u32.totalorder %s2103_s22, %s2183_s4 }
 0x1c1   : > { %p1644_p0 = scmp.lt.u32.totalorder %s1642_s25, %s1638_s9  ;;  %p1646_p9 = scmp.lt.u32.totalorder %s1638_s9, %s2103_s22 }
 0x1c2   : > { %p1640_p8 = pnand %p1639_p6, %p1847_p10 }
 0x1c3   : > { %p1645_p5 = por %p1644_p0, %p1643_p11 }
 0x1c4   : > { %p1641_p12 = pneg %p1640_p8 }
 0x1c5   : > { %p1647_p1 = por %p1646_p9, %p1645_p5 }
 0x1c7   : > { %p1648_p2 = pnand %p1647_p1, %p1641_p12 }
 0x1c9   : > { %1651 = shalt.err (!%p1648_p2)
}
 0x1ca   : > { %1407 = dma.vmem_to_hbm [thread:$0]  (%p1847_p10), %s2105_s5, 128, %s2103_s22, %s2107_s23  }
 0x1cb PF: > { %s962_s7 = sand.u32 1, %s1694_s15   ;;  %p2200_p3 = scmp.ne.s32.totalorder %s2189_s24, 0 }
 0x1cc   : > { %p2201_p7 = scmp.ge.s32.totalorder %s1714_s20, 2  ;;  %s963_s10 = scalar_lea.sflag [#allocation4], %s962_s7 }
 0x1ce   : > { %p1420_p13 = pnand %p2201_p7, %p2200_p3 }
 0x1d0   : > { %1685 = dma.done.wait (!%p1420_p13), %s963_s10, 2048  }
 0x1d1   : > { %1687 = vsyncadd (!%p1420_p13), %s963_s10, 4294965248  ;;  %s2202_s26 = sadd.s32 4294967294, %s1714_s20  }
 0x1d2   : > { %s971_s18 = sand.u32 1, %s2202_s26  }
 0x1d3   : > { %s972_s21 = scalar_lea.sflag [#allocation9], %s971_s18 }
 0x1d4   : > { %1689 = dma.done.wait (!%p1420_p13), %s972_s21, 256  }
 0x1d5   : > { %1691 = vsyncadd (!%p1420_p13), %s972_s21, 4294967040  ;;  %s25_s20 = sadd.s32 1, %s1714_s20   ;;  %s2203_s15 = smov %s1698_s16 }
 0x1d6   : > { %p22_p10 = scmp.ge.s32.totalorder %s25_s20, 4   ;;  %s2204_s16 = smov %s1702_s17 }
 0x1d7   : > { %s2205_s17 = smov %s1856_s8  ;;  %s2206_s18 = smov %s1710_s19 }
 0x1d8   : > { %s2207_s19 = smov %s2209_s29  ;;  %24 = sbr.rel (!%p22_p10) target bundleno = 9 (0x9), region = 110 }
 0x1df   :  { %986 = vsyncpa [#allocation3], 1 }
 0x1e0   :  { %988 = vsyncpa [#allocation3 + $0x1], 1 }
 0x1e1   :  { %989 = vsyncpa [#allocation6], 1 }
 0x1e2   :  { %990 = vsyncpa [#allocation4], 1 }
 0x1e3   :  { %992 = vsyncpa [#allocation4 + $0x1], 1 }
 0x1e4   :  { %993 = vsyncpa [#allocation9], 1 }
 0x1e5   :  { %995 = vsyncpa [#allocation9 + $0x1], 1 }

</bundles_post_ra>
